<compile_context>
chip_gen: v7x
topology: tpu7x:2x2x1
jax: 0.10.0
libtpu: 0.0.40
codegen_flags: <defaults>
</compile_context>

<pallas_src>
import functools

import jax
import jax.numpy as jnp
from jax.experimental import pallas as pl
from jax.experimental.pallas import tpu as pltpu

# Padded ("physical") layer sizes: lane axis multiples of 128, sublane axis
# multiples of 16 (bf16 native sublane packing).
H1_PAD = 512   # 500 -> 512
H2_PAD = 384   # 300 -> 384
C_PAD = 128    # 2   -> 128
SUBLANE = 16   # bf16 sublane granularity


def _round_up(x, m):
    return (x + m - 1) // m * m


def _cdiv(a, b):
    return -(-a // b)


def _choose_batch_tile(B, block_b):
    """Balanced tile: minimize pad waste; >=2 (even) grid steps on large B
    so v7x's second TensorCore is used. Returns (bb, n_steps)."""
    n = _cdiv(B, block_b)
    if B > 64:
        n = max(n, 2)
        if n % 2:
            n += 1
    bb = _round_up(_cdiv(B, n), SUBLANE)
    n = _cdiv(B, bb)
    return bb, n


def mlp_kernel(x_ref, w1_ref, b1_ref, w2_ref, b2_ref, w3_ref, b3_ref, o_ref):
    # Whole forward pass fused in one kernel: three bf16 MXU matmuls with f32
    # accumulation on VMEM-resident tiles; bias-add / ReLU on the VPU between.
    x = x_ref[...]                                                   # bf16
    h1 = jnp.dot(x, w1_ref[...], preferred_element_type=jnp.float32) + b1_ref[...]
    h1 = jnp.maximum(h1, 0.0).astype(jnp.bfloat16)
    h2 = jnp.dot(h1, w2_ref[...], preferred_element_type=jnp.float32) + b2_ref[...]
    h2 = jnp.maximum(h2, 0.0).astype(jnp.bfloat16)
    out = jnp.dot(h2, w3_ref[...], preferred_element_type=jnp.float32) + b3_ref[...]
    o_ref[...] = out.astype(o_ref.dtype)                             # bf16 store


@functools.partial(jax.jit, static_argnames=("block_b", "n_classes"))
def net_forward(x, padded_params, *, block_b=512, n_classes=2):
    """Forward pass of Net.

    x: [B, n_feature] float32; padded_params from `pad_params(init_params(...))`.
    Returns [B, n_classes] float32 logits.
    """
    w1, b1, w2, b2, w3, b3 = padded_params
    B, F = x.shape
    Fp = w1.shape[0]   # 16 for the 14-feature adult data
    H1 = w1.shape[1]   # 512
    H2 = w2.shape[1]   # 384
    Cp = w3.shape[1]   # 128

    bb, n_steps = _choose_batch_tile(B, block_b)
    B_pad = bb * n_steps

    # Cast activations to bf16 before padding (halves the HBM stream); zero
    # rows/cols flow through harmlessly (bias-only outputs) and are sliced off.
    x = x.astype(jnp.bfloat16)
    if B_pad != B or Fp != F:
        x = jnp.pad(x, ((0, B_pad - B), (0, Fp - F)))

    grid = (n_steps,)

    # Batch is tiled over the (parallel) grid; weights/biases are replicated
    # (constant index_map -> fetched once). Full-array blocks for the weights
    # satisfy the (8,128) rule because block_shape == full array dims.
    in_specs = [
        pl.BlockSpec((bb, Fp), lambda i: (i, 0)),    # x tile (bf16)
        pl.BlockSpec((Fp, H1), lambda i: (0, 0)),    # W1 (bf16)
        pl.BlockSpec((1, H1), lambda i: (0, 0)),     # b1 (f32)
        pl.BlockSpec((H1, H2), lambda i: (0, 0)),    # W2 (bf16)
        pl.BlockSpec((1, H2), lambda i: (0, 0)),     # b2 (f32)
        pl.BlockSpec((H2, Cp), lambda i: (0, 0)),    # W3 (bf16, class dim -> 128)
        pl.BlockSpec((1, Cp), lambda i: (0, 0)),     # b3 (f32)
    ]
    out_specs = pl.BlockSpec((bb, Cp), lambda i: (i, 0))

    flops = 2 * B_pad * (Fp * H1 + H1 * H2 + H2 * Cp)
    bytes_accessed = 2 * (                 # bf16 streams
        B_pad * Fp                         # x
        + Fp * H1 + H1 * H2 + H2 * Cp      # weights
        + B_pad * Cp                       # output
    ) + 4 * (H1 + H2 + Cp)                 # f32 biases

    out = pl.pallas_call(
        mlp_kernel,
        out_shape=jax.ShapeDtypeStruct((B_pad, Cp), jnp.bfloat16),
        grid=grid,
        in_specs=in_specs,
        out_specs=out_specs,
        compiler_params=pltpu.CompilerParams(
            dimension_semantics=("parallel",)),
        cost_estimate=pl.CostEstimate(
            flops=flops, transcendentals=0, bytes_accessed=bytes_accessed),
    )(x, w1, b1, w2, b2, w3, b3)

    return out[:B, :n_classes].astype(jnp.float32)


def init_params(key, n_feature):
    """Deterministic init mimicking PyTorch nn.Linear defaults
    (uniform in +/- 1/sqrt(fan_in)). Weights stored as [in, out], logical sizes."""
    dims = [(n_feature, 500), (500, 300), (300, 2)]
    params = []
    for (fan_in, fan_out) in dims:
        key, kw, kb = jax.random.split(key, 3)
        bound = 1.0 / jnp.sqrt(fan_in)
        w = jax.random.uniform(kw, (fan_in, fan_out), jnp.float32, -bound, bound)
        b = jax.random.uniform(kb, (1, fan_out), jnp.float32, -bound, bound)
        params += [w, b]
    return tuple(params)


def pad_params(params):
    """Zero-pad logical params (feat/500/300/2) to MXU-friendly physical sizes
    (16/512/384/128) and cast weights to bf16 (biases stay f32: they are added
    to the f32 accumulator). Zero columns of W1/b1 produce zero activations;
    zero rows of W2/W3 absorb them; extra output columns are all-zero and are
    sliced off in the wrapper -> padding is mathematically inert."""
    w1, b1, w2, b2, w3, b3 = params
    F = w1.shape[0]
    Fp = _round_up(F, SUBLANE)
    w1p = jnp.zeros((Fp, H1_PAD), jnp.float32).at[:F, :w1.shape[1]].set(w1)
    b1p = jnp.zeros((1, H1_PAD), jnp.float32).at[:, :b1.shape[1]].set(b1)
    w2p = jnp.zeros((H1_PAD, H2_PAD), jnp.float32).at[:w2.shape[0], :w2.shape[1]].set(w2)
    b2p = jnp.zeros((1, H2_PAD), jnp.float32).at[:, :b2.shape[1]].set(b2)
    w3p = jnp.zeros((H2_PAD, C_PAD), jnp.float32).at[:w3.shape[0], :w3.shape[1]].set(w3)
    b3p = jnp.zeros((1, C_PAD), jnp.float32).at[:, :b3.shape[1]].set(b3)
    return (w1p.astype(jnp.bfloat16), b1p,
            w2p.astype(jnp.bfloat16), b2p,
            w3p.astype(jnp.bfloat16), b3p)


def net_forward_ref(x, params):
    """Pure-JAX f32 reference (logical, unpadded params) for correctness checks."""
    w1, b1, w2, b2, w3, b3 = params
    h1 = jnp.maximum(x @ w1 + b1, 0.0)
    h2 = jnp.maximum(h1 @ w2 + b2, 0.0)
    return h2 @ w3 + b3


if __name__ == "__main__":
    key = jax.random.PRNGKey(0)
    n_feature = 14   # adult dataset raw feature count

    key, kx, kp = jax.random.split(key, 3)
    params = init_params(kp, n_feature)
    pparams = pad_params(params)

    # bf16 operands (f32 accumulation) -> loose-ish tolerance vs f32 reference.
    ATOL, RTOL = 5e-2, 5e-2

    # Small aligned batch (single grid step).
    x = jax.random.normal(kx, (16, n_feature), jnp.float32)
    out = jax.block_until_ready(net_forward(x, pparams))
    ref = net_forward_ref(x, params)
    assert out.shape == (16, 2)
    assert jnp.allclose(out, ref, atol=ATOL, rtol=RTOL), "mismatch vs reference"

    # Ragged batch (exercises zero-pad path).
    x_r = x[:10]
    out_r = jax.block_until_ready(net_forward(x_r, pparams))
    ref_r = net_forward_ref(x_r, params)
    assert out_r.shape == (10, 2)
    assert jnp.allclose(out_r, ref_r, atol=ATOL, rtol=RTOL), "ragged mismatch"

    # Batch > 64: exercises the balanced-tile / even-grid (megacore) path.
    key, kx2 = jax.random.split(key)
    x_big = jax.random.normal(kx2, (130, n_feature), jnp.float32)
    out_b = jax.block_until_ready(net_forward(x_big, pparams))
    ref_b = net_forward_ref(x_big, params)
    assert out_b.shape == (130, 2)
    assert jnp.allclose(out_b, ref_b, atol=ATOL, rtol=RTOL), "big-batch mismatch"

    print("KERNEL_OK")
</pallas_src>

<mosaic_0001>
module attributes {stable_mosaic.version = 11 : i64} {
  func.func @mlp_kernel(%arg0: i32, %arg1: memref<16x16xbf16, #tpu.memory_space<vmem>>, %arg2: memref<16x512xbf16, #tpu.memory_space<vmem>>, %arg3: memref<1x512xf32, #tpu.memory_space<vmem>>, %arg4: memref<512x384xbf16, #tpu.memory_space<vmem>>, %arg5: memref<1x384xf32, #tpu.memory_space<vmem>>, %arg6: memref<384x128xbf16, #tpu.memory_space<vmem>>, %arg7: memref<1x128xf32, #tpu.memory_space<vmem>>, %arg8: memref<16x128xbf16, #tpu.memory_space<vmem>>) attributes {dimension_semantics = [#tpu.dimension_semantics<parallel>], iteration_bounds = array<i64: 1>, scalar_prefetch = 0 : i64, scratch_operands = 0 : i64, tpu.core_type = #tpu.core_type<tc>, window_params = [{transform_indices = @transform_0, window_bounds = array<i64: 16, 16>}, {pipeline_mode = #tpu.pipeline_mode<synchronous>, transform_indices = @transform_1, window_bounds = array<i64: 16, 512>}, {pipeline_mode = #tpu.pipeline_mode<synchronous>, transform_indices = @transform_2, window_bounds = array<i64: 1, 512>}, {pipeline_mode = #tpu.pipeline_mode<synchronous>, transform_indices = @transform_3, window_bounds = array<i64: 512, 384>}, {pipeline_mode = #tpu.pipeline_mode<synchronous>, transform_indices = @transform_4, window_bounds = array<i64: 1, 384>}, {pipeline_mode = #tpu.pipeline_mode<synchronous>, transform_indices = @transform_5, window_bounds = array<i64: 384, 128>}, {pipeline_mode = #tpu.pipeline_mode<synchronous>, transform_indices = @transform_6, window_bounds = array<i64: 1, 128>}, {transform_indices = @transform_7, window_bounds = array<i64: 16, 128>}]} {
    %c0 = arith.constant 0 : index
    %c0_0 = arith.constant 0 : index
    %0 = vector.load %arg1[%c0, %c0_0] : memref<16x16xbf16, #tpu.memory_space<vmem>>, vector<16x16xbf16>
    %c0_1 = arith.constant 0 : index
    %c0_2 = arith.constant 0 : index
    %1 = vector.load %arg2[%c0_1, %c0_2] : memref<16x512xbf16, #tpu.memory_space<vmem>>, vector<16x512xbf16>
    %cst = arith.constant dense<0.000000e+00> : vector<16x512xf32>
    %2 = tpu.matmul %0, %1, %cst {dimension_numbers = #tpu.dot_dimension_numbers<[1], [0], [0], [1], [0, 0, 1, 1], [], []>} : vector<16x16xbf16>, vector<16x512xbf16>, vector<16x512xf32> -> vector<16x512xf32>
    %c0_3 = arith.constant 0 : index
    %c0_4 = arith.constant 0 : index
    %3 = vector.load %arg3[%c0_3, %c0_4] : memref<1x512xf32, #tpu.memory_space<vmem>>, vector<1x512xf32>
    %4 = vector.broadcast %3 : vector<1x512xf32> to vector<16x512xf32>
    %5 = arith.addf %2, %4 : vector<16x512xf32>
    %cst_5 = arith.constant 0.000000e+00 : f32
    %6 = vector.broadcast %cst_5 : f32 to vector<16x512xf32>
    %7 = arith.maximumf %5, %6 : vector<16x512xf32>
    %8 = arith.truncf %7 : vector<16x512xf32> to vector<16x512xbf16>
    %c0_6 = arith.constant 0 : index
    %c0_7 = arith.constant 0 : index
    %9 = vector.load %arg4[%c0_6, %c0_7] : memref<512x384xbf16, #tpu.memory_space<vmem>>, vector<512x384xbf16>
    %cst_8 = arith.constant dense<0.000000e+00> : vector<16x384xf32>
    %10 = tpu.matmul %8, %9, %cst_8 {dimension_numbers = #tpu.dot_dimension_numbers<[1], [0], [0], [1], [0, 0, 1, 1], [], []>} : vector<16x512xbf16>, vector<512x384xbf16>, vector<16x384xf32> -> vector<16x384xf32>
    %c0_9 = arith.constant 0 : index
    %c0_10 = arith.constant 0 : index
    %11 = vector.load %arg5[%c0_9, %c0_10] : memref<1x384xf32, #tpu.memory_space<vmem>>, vector<1x384xf32>
    %12 = vector.broadcast %11 : vector<1x384xf32> to vector<16x384xf32>
    %13 = arith.addf %10, %12 : vector<16x384xf32>
    %cst_11 = arith.constant 0.000000e+00 : f32
    %14 = vector.broadcast %cst_11 : f32 to vector<16x384xf32>
    %15 = arith.maximumf %13, %14 : vector<16x384xf32>
    %16 = arith.truncf %15 : vector<16x384xf32> to vector<16x384xbf16>
    %c0_12 = arith.constant 0 : index
    %c0_13 = arith.constant 0 : index
    %17 = vector.load %arg6[%c0_12, %c0_13] : memref<384x128xbf16, #tpu.memory_space<vmem>>, vector<384x128xbf16>
    %cst_14 = arith.constant dense<0.000000e+00> : vector<16x128xf32>
    %18 = tpu.matmul %16, %17, %cst_14 {dimension_numbers = #tpu.dot_dimension_numbers<[1], [0], [0], [1], [0, 0, 1, 1], [], []>} : vector<16x384xbf16>, vector<384x128xbf16>, vector<16x128xf32> -> vector<16x128xf32>
    %c0_15 = arith.constant 0 : index
    %c0_16 = arith.constant 0 : index
    %19 = vector.load %arg7[%c0_15, %c0_16] : memref<1x128xf32, #tpu.memory_space<vmem>>, vector<1x128xf32>
    %20 = vector.broadcast %19 : vector<1x128xf32> to vector<16x128xf32>
    %21 = arith.addf %18, %20 : vector<16x128xf32>
    %22 = arith.truncf %21 : vector<16x128xf32> to vector<16x128xbf16>
    %c0_17 = arith.constant 0 : index
    %c0_18 = arith.constant 0 : index
    %23 = vector.load %arg8[%c0_17, %c0_18] : memref<16x128xbf16, #tpu.memory_space<vmem>>, vector<16x128xbf16>
    tpu.vector_store %arg8[%c0_17, %c0_18], %22 {strides = array<i32>} : memref<16x128xbf16, #tpu.memory_space<vmem>>, vector<16x128xbf16>,
    return
  }
  func.func @transform_0(%arg0: i32) -> (i32, i32) {
    %c0_i32 = arith.constant 0 : i32
    %c0_i32_0 = arith.constant 0 : i32
    return %arg0, %c0_i32 : i32, i32
  }
  func.func @transform_1(%arg0: i32) -> (i32, i32) {
    %c0_i32 = arith.constant 0 : i32
    %c0_i32_0 = arith.constant 0 : i32
    %c0_i32_1 = arith.constant 0 : i32
    return %c0_i32, %c0_i32_0 : i32, i32
  }
  func.func @transform_2(%arg0: i32) -> (i32, i32) {
    %c0_i32 = arith.constant 0 : i32
    %c0_i32_0 = arith.constant 0 : i32
    %c0_i32_1 = arith.constant 0 : i32
    return %c0_i32, %c0_i32_0 : i32, i32
  }
  func.func @transform_3(%arg0: i32) -> (i32, i32) {
    %c0_i32 = arith.constant 0 : i32
    %c0_i32_0 = arith.constant 0 : i32
    %c0_i32_1 = arith.constant 0 : i32
    return %c0_i32, %c0_i32_0 : i32, i32
  }
  func.func @transform_4(%arg0: i32) -> (i32, i32) {
    %c0_i32 = arith.constant 0 : i32
    %c0_i32_0 = arith.constant 0 : i32
    %c0_i32_1 = arith.constant 0 : i32
    return %c0_i32, %c0_i32_0 : i32, i32
  }
  func.func @transform_5(%arg0: i32) -> (i32, i32) {
    %c0_i32 = arith.constant 0 : i32
    %c0_i32_0 = arith.constant 0 : i32
    %c0_i32_1 = arith.constant 0 : i32
    return %c0_i32, %c0_i32_0 : i32, i32
  }
  func.func @transform_6(%arg0: i32) -> (i32, i32) {
    %c0_i32 = arith.constant 0 : i32
    %c0_i32_0 = arith.constant 0 : i32
    %c0_i32_1 = arith.constant 0 : i32
    return %c0_i32, %c0_i32_0 : i32, i32
  }
  func.func @transform_7(%arg0: i32) -> (i32, i32) {
    %c0_i32 = arith.constant 0 : i32
    %c0_i32_0 = arith.constant 0 : i32
    return %arg0, %c0_i32 : i32, i32
  }
}

</mosaic_0001>

<bundles_post_ra>
// kernel: net_forward.1
= control target key start
LH: loop header
LB: loop body
LE: loop exit
PB: predicated region body
PF: predicated region fallthrough
CT: control target
= control target key end

     0   :  { %12 = vsyncpa [#allocation3], 0  ;;  %s1928_s0 = inlined_call_operand.vmem [shape: bf16[16,16], index: 0, kind: input, shape index: {}]   ;;  %s1929_s1 = inlined_call_operand.vmem [shape: bf16[16,512], index: 1, kind: input, shape index: {}]   ;;  %s1930_s2 = inlined_call_operand.vmem [shape: f32[1,512], index: 2, kind: input, shape index: {}]   ;;  %s1931_s3 = inlined_call_operand.hbm [shape: bf16[512,384], index: 3, kind: input, shape index: {}]   ;;  %s1932_s4 = inlined_call_operand.vmem [shape: f32[1,384], index: 4, kind: input, shape index: {}]   ;;  %s1933_s5 = inlined_call_operand.hbm [shape: bf16[384,128], index: 5, kind: input, shape index: {}]   ;;  %s1934_s6 = inlined_call_operand.vmem [shape: f32[1,128], index: 6, kind: input, shape index: {}]   ;;  %s1935_s7 = inlined_call_operand.vmem [shape: bf16[16,128], index: 7, kind: output, shape index: {}]  }
   0x1   :  { %13 = vsyncpa [#allocation5], 0  ;;  %s1797_s24 = smov [#allocation2]   ;;  %s1749_s28 = scalar_lea.hbm %s1931_s3, 12288 }
   0x2   :  { %s25_s25 = sshll.u32 %s1797_s24, 4  ;;  %p1750_p0 = scmp.ne.s32.totalorder %s1931_s3, %s1749_s28  ;;  %s26_s25 = int_to_ptr.vmem [resolvable:$true] %s25_s25 }
   0x3   :  { %p1753_p1 = scmp.lt.u32.totalorder %s1749_s28, %s1931_s3 }
   0x5   :  { %p1755_p2 = pnand %p1753_p1, %p1750_p0 }
   0x7   :  { %1758 = shalt.err (!%p1755_p2)
}
   0x8   :  { %s1759_s10 = scalar_lea.vmem %s26_s25, 12288  ;;  %p1764_p4 = scmp.lt.s32.totalorder %s26_s25, %s26_s25 }
   0x9   :  { %p1760_p3 = scmp.ne.s32.totalorder %s26_s25, %s1759_s10  ;;  %p1765_p5 = scmp.lt.s32.totalorder %s1759_s10, %s1759_s10 }
   0xb   :  { %p1766_p6 = por %p1765_p5, %p1764_p4 }
   0xd   :  { %p1767_p7 = pnand %p1766_p6, %p1760_p3 }
   0xf   :  { %1770 = shalt.err (!%p1767_p7)
}
  0x10   :  { %s1798_s11 = smov 192   ;;  %s1799_s12 = smov 12  }
  0x11   :  { %31 = dma.hbm_to_vmem [thread:$0]  %s1931_s3, 12288, %s26_s25, [#allocation3], %s1798_s11, %s1798_s11, %s1799_s12  }
  0x12   :  { %s1800_s15 = smov [#allocation4]   ;;  %s1771_s19 = scalar_lea.hbm %s1933_s5, 3072 }
  0x13   :  { %s39_s16 = sshll.u32 %s1800_s15, 4  ;;  %p1772_p8 = scmp.ne.s32.totalorder %s1933_s5, %s1771_s19  ;;  %s40_s16 = int_to_ptr.vmem [resolvable:$true] %s39_s16 }
  0x14   :  { %p1775_p9 = scmp.lt.u32.totalorder %s1771_s19, %s1933_s5 }
  0x16   :  { %p1777_p10 = pnand %p1775_p9, %p1772_p8 }
  0x18   :  { %1780 = shalt.err (!%p1777_p10)
}
  0x19   :  { %s1781_s24 = scalar_lea.vmem %s40_s16, 3072  ;;  %p1786_p12 = scmp.lt.s32.totalorder %s40_s16, %s40_s16 }
  0x1a   :  { %p1782_p11 = scmp.ne.s32.totalorder %s40_s16, %s1781_s24  ;;  %p1787_p13 = scmp.lt.s32.totalorder %s1781_s24, %s1781_s24 }
  0x1c   :  { %p1788_p0 = por %p1787_p13, %p1786_p12 }
  0x1e   :  { %p1789_p1 = pnand %p1788_p0, %p1782_p11 }
  0x20   :  { %1792 = shalt.err (!%p1789_p1)
}
  0x21   :  { %s1801_s3 = smov 64   ;;  %s1802_s25 = smov 4  }
  0x22   :  { %45 = dma.hbm_to_vmem [thread:$0]  %s1933_s5, 3072, %s40_s16, [#allocation5], %s1801_s3, %s1801_s3, %s1802_s25  }
  0x23   :  { %1793 = dma.done.wait [#allocation3], 12288  }
  0x24   :  { %1794 = vsyncadd [#allocation3], 4294955008 }
  0x25   :  { %1795 = dma.done.wait [#allocation5], 3072  }
  0x26   :  { %1796 = vsyncadd [#allocation5], 4294964224  ;;  %v1803_v0 = vmov 0   ;;  %v1590_v1 = vld [vmem:[%s1929_s1 + $0x4] ss:$16 sps:$4 sm:$0xff]   ;;  %vm108_vm0 = vcmask 130048   ;;  %v63_v56 = vlaneseq }
  0x27   :  { %144 = vmatprep.mubr.bf16.mxu0 %v1803_v0  ;;  %187 = vmatprep.mubr.bf16.mxu1 %v1803_v0  ;;  %v1592_v2 = vld [vmem:[%s1929_s1] ss:$16 sps:$4 sm:$0xff]   ;;  %v1594_v4 = vld [vmem:[%s1929_s1 + $0xc] ss:$16 sps:$4 sm:$0xff]   ;;  %v1596_v5 = vld [vmem:[%s1929_s1 + $0x8] ss:$16 sps:$4 sm:$0xff]  }
  0x28   :  { %112 = vmatprep.subr.bf16.mxu0 %v1590_v1  ;;  %v1593_v3 = vld [vmem:[%s1928_s0] sm:$0xff]   ;;  %155 = vmatprep.subr.bf16.mxu1 %v1594_v4  ;;  %v1602_v8 = vld [vmem:[#allocation2 + $0x1c] ss:$12 sps:$4 sm:$0xff]   ;;  %v1608_v12 = vld [vmem:[#allocation2 + $0x4c] ss:$12 sps:$4 sm:$0xff]   ;;  %v1885_v57 = vshrl.u32 %v63_v56, 7 }
  0x29   :  { %113 = vmatpush1.bf16.msra.mxu0 %v1592_v2  ;;  %v1597_v6 = vld [vmem:[#allocation2] ss:$12 sps:$4 sm:$0xff]   ;;  %v1599_v7 = vld [vmem:[#allocation2 + $0x4] ss:$12 sps:$4 sm:$0xff]   ;;  %156 = vmatpush1.bf16.msra.mxu1 %v1596_v5  ;;  %v1606_v13 = vld [vmem:[#allocation2 + $0x48] ss:$12 sps:$4 sm:$0xff]  }
  0x2a   :  { %867 = vmatprep.subr.bf16.mxu0 %v1599_v7  ;;  %v1600_v9 = vld [vmem:[#allocation2 + $0x18] ss:$12 sps:$4 sm:$0xff]   ;;  %v1605_v10 = vld [vmem:[#allocation2 + $0x34] ss:$12 sps:$4 sm:$0xff]   ;;  %v1603_v11 = vld [vmem:[#allocation2 + $0x30] ss:$12 sps:$4 sm:$0xff]  }
  0x2b   :  { %v1611_v14 = vld [vmem:[#allocation2 + $0x64] ss:$12 sps:$4 sm:$0xff]   ;;  %v1624_v15 = vld [vmem:[#allocation2 + $0xc8] ss:$12 sps:$4 sm:$0xff]   ;;  %v1609_v17 = vld [vmem:[#allocation2 + $0x60] ss:$12 sps:$4 sm:$0xff]  }
  0x2c   :  { %1346 = vmatmul.mubr.msk.bf16.vlgmr.msra.gmra.mrb[0].mxu0 %vm108_vm0, %v1593_v3  ;;  %1347 = vmatmul.mubr.msk.bf16.vlgmr.msra.gmra.mrb[0].mxu1 %vm108_vm0, %v1593_v3  ;;  %v1625_v16 = vld [vmem:[#allocation2 + $0x8] ss:$12 sps:$4 sm:$0xff]   ;;  %v1629_v18 = vld [vmem:[#allocation2 + $0xe0] ss:$12 sps:$4 sm:$0xff]   ;;  %v1612_v21 = vld [vmem:[#allocation2 + $0x78] ss:$12 sps:$4 sm:$0xff]  }
  0x2d   :  { %868 = vmatpush1.bf16.msra.mxu0 %v1597_v6  ;;  %1478 = vmatprep.subr.bf16.mxu1 %v1624_v15  ;;  %v1630_v19 = vld [vmem:[#allocation2 + $0x20] ss:$12 sps:$4 sm:$0xff]   ;;  %v1614_v20 = vld [vmem:[#allocation2 + $0x7c] ss:$12 sps:$4 sm:$0xff]   ;;  %v1634_v22 = vld [vmem:[#allocation2 + $0xf8] ss:$12 sps:$4 sm:$0xff]  }
  0x2e   :  { %869 = vmatprep.subr.bf16.mxu0 %v1602_v8  ;;  %1479 = vmatpush3.bf16.msra.mxu1 %v1625_v16  ;;  %v1635_v23 = vld [vmem:[#allocation2 + $0x38] ss:$12 sps:$4 sm:$0xff]   ;;  %v1617_v24 = vld [vmem:[#allocation2 + $0x94] ss:$12 sps:$4 sm:$0xff]   ;;  %v1639_v25 = vld [vmem:[#allocation2 + $0x110] ss:$12 sps:$4 sm:$0xff]  }
  0x2f   :  { %1480 = vmatprep.subr.bf16.mxu1 %v1629_v18  ;;  %v1640_v26 = vld [vmem:[#allocation2 + $0x50] ss:$12 sps:$4 sm:$0xff]   ;;  %v1620_v28 = vld [vmem:[#allocation2 + $0xac] ss:$12 sps:$4 sm:$0xff]   ;;  %v1644_v29 = vld [vmem:[#allocation2 + $0x128] ss:$12 sps:$4 sm:$0xff]  }
  0x30   :  { %v1615_v27 = vld [vmem:[#allocation2 + $0x90] ss:$12 sps:$4 sm:$0xff]   ;;  %v1618_v30 = vld [vmem:[#allocation2 + $0xa8] ss:$12 sps:$4 sm:$0xff]   ;;  %v1649_v33 = vld [vmem:[#allocation2 + $0x140] ss:$12 sps:$4 sm:$0xff]  }
  0x31   :  { %870 = vmatpush1.bf16.msra.mxu0 %v1600_v9  ;;  %v1645_v31 = vld [vmem:[#allocation2 + $0x68] ss:$12 sps:$4 sm:$0xff]   ;;  %v1623_v32 = vld [vmem:[#allocation2 + $0xc4] ss:$12 sps:$4 sm:$0xff]   ;;  %v1621_v34 = vld [vmem:[#allocation2 + $0xc0] ss:$12 sps:$4 sm:$0xff]  }
  0x32   :  { %871 = vmatprep.subr.bf16.mxu0 %v1605_v10  ;;  %1481 = vmatpush3.bf16.msra.mxu1 %v1630_v19  ;;  %v1650_v35 = vld [vmem:[#allocation2 + $0x80] ss:$12 sps:$4 sm:$0xff]   ;;  %v1628_v36 = vld [vmem:[#allocation2 + $0xdc] ss:$12 sps:$4 sm:$0xff]   ;;  %v1626_v37 = vld [vmem:[#allocation2 + $0xd8] ss:$12 sps:$4 sm:$0xff]  }
  0x33   :  { %1482 = vmatprep.subr.bf16.mxu1 %v1634_v22  ;;  %v1633_v38 = vld [vmem:[#allocation2 + $0xf4] ss:$12 sps:$4 sm:$0xff]   ;;  %v1631_v39 = vld [vmem:[#allocation2 + $0xf0] ss:$12 sps:$4 sm:$0xff]   ;;  %v1638_v40 = vld [vmem:[#allocation2 + $0x10c] ss:$12 sps:$4 sm:$0xff]  }
  0x34   :  { %v1636_v41 = vld [vmem:[#allocation2 + $0x108] ss:$12 sps:$4 sm:$0xff]   ;;  %v1643_v42 = vld [vmem:[#allocation2 + $0x124] ss:$12 sps:$4 sm:$0xff]   ;;  %v1641_v43 = vld [vmem:[#allocation2 + $0x120] ss:$12 sps:$4 sm:$0xff]  }
  0x35   :  { %872 = vmatpush1.bf16.msra.mxu0 %v1603_v11  ;;  %v1648_v44 = vld [vmem:[#allocation2 + $0x13c] ss:$12 sps:$4 sm:$0xff]   ;;  %v1646_v45 = vld [vmem:[#allocation2 + $0x138] ss:$12 sps:$4 sm:$0xff]   ;;  %v1653_v46 = vld [vmem:[#allocation2 + $0x154] ss:$12 sps:$4 sm:$0xff]  }
  0x36   :  { %873 = vmatprep.subr.bf16.mxu0 %v1608_v12  ;;  %1483 = vmatpush3.bf16.msra.mxu1 %v1635_v23  ;;  %v1654_v47 = vld [vmem:[#allocation2 + $0x158] ss:$12 sps:$4 sm:$0xff]   ;;  %v1651_v48 = vld [vmem:[#allocation2 + $0x150] ss:$12 sps:$4 sm:$0xff]   ;;  %v1656_v52 = vld [vmem:[#allocation2 + $0x168] ss:$12 sps:$4 sm:$0xff]  }
  0x37   :  { %1484 = vmatprep.subr.bf16.mxu1 %v1639_v25  ;;  %v1655_v49 = vld [vmem:[#allocation2 + $0x98] ss:$12 sps:$4 sm:$0xff]   ;;  %v1659_v51 = vld [vmem:[#allocation2 + $0x170] ss:$12 sps:$4 sm:$0xff]   ;;  %v1664_v55 = vld [vmem:[#allocation2 + $0x248] ss:$12 sps:$4 sm:$0xff]  }
  0x38   :  { %v1658_v50 = vld [vmem:[#allocation2 + $0x16c] ss:$12 sps:$4 sm:$0xff]   ;;  %v1660_v53 = vld [vmem:[#allocation2 + $0xb0] ss:$12 sps:$4 sm:$0xff]   ;;  %v65_v58 = vsub.s32 0, %v1885_v57  ;;  %v69_v60 = vsub.s32 1, %v1885_v57 }
  0x39   :  { %874 = vmatpush1.bf16.msra.mxu0 %v1606_v13  ;;  %v1663_v54 = vld [vmem:[#allocation2 + $0x184] ss:$12 sps:$4 sm:$0xff]   ;;  %v61_v59 = vld [vmem:[%s1930_s2] sm:$0xf]  ;;  %v73_v61 = vsub.s32 2, %v1885_v57  ;;  %v77_v63 = vsub.s32 3, %v1885_v57 }
  0x3a   :  { %875 = vmatprep.subr.bf16.mxu0 %v1611_v14  ;;  %1485 = vmatpush3.bf16.msra.mxu1 %v1640_v26  ;;  %v66_v62 = vrot.slane %v61_v59, %v65_v58  ;;  %v70_v0 = vrot.slane %v61_v59, %v69_v60  ;;  %v1695_v56 = vld [vmem:[#allocation2 + $0x218] ss:$12 sps:$4 sm:$0xff]   ;;  %v1742_v57 = vld [vmem:[#allocation4 + $0x88] sm:$0xff]   ;;  %vm1805_vm1 = vmmov 0  }
  0x3b   :  { %1486 = vmatprep.subr.bf16.mxu1 %v1644_v29  ;;  %v74_v2 = vrot.slane %v61_v59, %v73_v61  ;;  %v78_v5 = vrot.slane %v61_v59, %v77_v63  ;;  %v1698_v59 = vld [vmem:[#allocation2 + $0x22c] ss:$12 sps:$4 sm:$0xff]   ;;  %v1696_v63 = vld [vmem:[#allocation2 + $0x228] ss:$12 sps:$4 sm:$0xff]  }
  0x3d   :  { %876 = vmatpush1.bf16.msra.mxu0 %v1609_v17 }
  0x3e   :  { %877 = vmatprep.subr.bf16.mxu0 %v1614_v20  ;;  %1487 = vmatpush3.bf16.msra.mxu1 %v1645_v31  ;;  %v1669_v31 = vld [vmem:[#allocation2 + $0x260] ss:$12 sps:$4 sm:$0xff]  }
  0x3f   :  { %1488 = vmatprep.subr.bf16.mxu1 %v1649_v33 }
  0x41   :  { %878 = vmatpush1.bf16.msra.mxu0 %v1612_v21 }
  0x42   :  { %879 = vmatprep.subr.bf16.mxu0 %v1617_v24  ;;  %1489 = vmatpush3.bf16.msra.mxu1 %v1650_v35  ;;  %v1666_v35 = vld [vmem:[#allocation2 + $0x198] ss:$12 sps:$4 sm:$0xff]  }
  0x43   :  { %1490 = vmatprep.subr.bf16.mxu1 %v1654_v47  ;;  %v1681_v47 = vld [vmem:[#allocation2 + $0x1e0] ss:$12 sps:$4 sm:$0xff]  }
  0x45   :  { %880 = vmatpush1.bf16.msra.mxu0 %v1615_v27  ;;  %v1661_v27 = vld [vmem:[#allocation2 + $0x180] ss:$12 sps:$4 sm:$0xff]  }
  0x46   :  { %881 = vmatprep.subr.bf16.mxu0 %v1620_v28  ;;  %1491 = vmatpush3.bf16.msra.mxu1 %v1655_v49  ;;  %v1665_v28 = vld [vmem:[#allocation2 + $0x188] ss:$12 sps:$4 sm:$0xff]  }
  0x47   :  { %1492 = vmatprep.subr.bf16.mxu1 %v1659_v51  ;;  %v1688_v49 = vld [vmem:[#allocation2 + $0x1fc] ss:$12 sps:$4 sm:$0xff]   ;;  %v1686_v51 = vld [vmem:[#allocation2 + $0x1f8] ss:$12 sps:$4 sm:$0xff]  }
  0x49   :  { %882 = vmatpush1.bf16.msra.mxu0 %v1618_v30  ;;  %v1668_v30 = vld [vmem:[#allocation2 + $0x19c] ss:$12 sps:$4 sm:$0xff]  }
  0x4a   :  { %883 = vmatprep.subr.bf16.mxu0 %v1623_v32  ;;  %1493 = vmatpush3.bf16.msra.mxu1 %v1660_v53  ;;  %v1693_v53 = vld [vmem:[#allocation2 + $0x214] ss:$12 sps:$4 sm:$0xff]  }
  0x4b   :  { %1500 = vmatprep.subr.bf16.mxu1 %v1664_v55  ;;  %v1691_v55 = vld [vmem:[#allocation2 + $0x210] ss:$12 sps:$4 sm:$0xff]  }
  0x4d   :  { %884 = vmatpush1.bf16.msra.mxu0 %v1621_v34 }
  0x4e   :  { %885 = vmatprep.subr.bf16.mxu0 %v1628_v36  ;;  %v1670_v36 = vld [vmem:[#allocation2 + $0x1a0] ss:$12 sps:$4 sm:$0xff]  }
  0x51   :  { %886 = vmatpush1.bf16.msra.mxu0 %v1626_v37  ;;  %v1673_v37 = vld [vmem:[#allocation2 + $0x1b4] ss:$12 sps:$4 sm:$0xff]  }
  0x52   :  { %887 = vmatprep.subr.bf16.mxu0 %v1633_v38  ;;  %v1674_v38 = vld [vmem:[#allocation2 + $0x278] ss:$12 sps:$4 sm:$0xff]  }
  0x55   :  { %888 = vmatpush1.bf16.msra.mxu0 %v1631_v39  ;;  %v1671_v39 = vld [vmem:[#allocation2 + $0x1b0] ss:$12 sps:$4 sm:$0xff]  }
  0x56   :  { %889 = vmatprep.subr.bf16.mxu0 %v1638_v40  ;;  %v1675_v40 = vld [vmem:[#allocation2 + $0x1b8] ss:$12 sps:$4 sm:$0xff]  }
  0x59   :  { %890 = vmatpush1.bf16.msra.mxu0 %v1636_v41  ;;  %v1678_v41 = vld [vmem:[#allocation2 + $0x1cc] ss:$12 sps:$4 sm:$0xff]  }
  0x5a   :  { %891 = vmatprep.subr.bf16.mxu0 %v1643_v42  ;;  %v1679_v42 = vld [vmem:[#allocation2 + $0x290] ss:$12 sps:$4 sm:$0xff]  }
  0x5d   :  { %892 = vmatpush1.bf16.msra.mxu0 %v1641_v43  ;;  %v1676_v43 = vld [vmem:[#allocation2 + $0x1c8] ss:$12 sps:$4 sm:$0xff]  }
  0x5e   :  { %893 = vmatprep.subr.bf16.mxu0 %v1648_v44  ;;  %v1680_v44 = vld [vmem:[#allocation2 + $0x1d0] ss:$12 sps:$4 sm:$0xff]  }
  0x61   :  { %894 = vmatpush1.bf16.msra.mxu0 %v1646_v45  ;;  %v1683_v45 = vld [vmem:[#allocation2 + $0x1e4] ss:$12 sps:$4 sm:$0xff]  }
  0x62   :  { %895 = vmatprep.subr.bf16.mxu0 %v1653_v46  ;;  %v1684_v46 = vld [vmem:[#allocation2 + $0x2a8] ss:$12 sps:$4 sm:$0xff]  }
  0x65   :  { %896 = vmatpush1.bf16.msra.mxu0 %v1651_v48  ;;  %v1685_v48 = vld [vmem:[#allocation2 + $0x1e8] ss:$12 sps:$4 sm:$0xff]  }
  0x66   :  { %897 = vmatprep.subr.bf16.mxu0 %v1658_v50  ;;  %v1689_v50 = vld [vmem:[#allocation2 + $0x2c0] ss:$12 sps:$4 sm:$0xff]  }
  0x69   :  { %898 = vmatpush1.bf16.msra.mxu0 %v1656_v52  ;;  %v1690_v52 = vld [vmem:[#allocation2 + $0x200] ss:$12 sps:$4 sm:$0xff]  }
  0x6a   :  { %910 = vmatprep.subr.bf16.mxu0 %v1663_v54  ;;  %v1694_v54 = vld [vmem:[#allocation2 + $0x2d8] ss:$12 sps:$4 sm:$0xff]  }
  0xff   :  { %v146_v1 = vpop.f32.mrb[0].mxu0  ;;  %v189_v10 = vpop.f32.mrb[0].mxu1 }
 0x100   :  { %v147_v3 = vadd.f32 %v146_v1, %v66_v62  ;;  %v148_v4 = vpop.f32.mrb[1].mxu0  ;;  %v190_v12 = vadd.f32 %v189_v10, %v74_v2  ;;  %v191_v13 = vpop.f32.mrb[1].mxu1  ;;  %v1703_v1 = vld [vmem:[#allocation2 + $0x244] ss:$12 sps:$4 sm:$0xff]   ;;  %v1713_v10 = vld [vmem:[#allocation2 + $0x2a0] ss:$12 sps:$4 sm:$0xff]  }
 0x101   :  { %v149_v6 = vadd.f32 %v148_v4, %v70_v0  ;;  %v150_v7 = vpop.f32.mrb[2].mxu0  ;;  %v192_v16 = vadd.f32 %v191_v13, %v78_v5  ;;  %v193_v17 = vpop.f32.mrb[2].mxu1  ;;  %v1704_v4 = vld [vmem:[#allocation2 + $0x258] ss:$12 sps:$4 sm:$0xff]   ;;  %v1721_v13 = vld [vmem:[#allocation2 + $0x2d4] ss:$12 sps:$4 sm:$0xff]  }
 0x102   :  { %v151_v8 = vadd.f32 %v150_v7, %v66_v62  ;;  %v152_v9 = vpop.f32.mrb[3].mxu0  ;;  %v198_v14 = vmax.f32 %v147_v3, 0.0  ;;  %v200_v20 = vmax.f32 %v190_v12, 0.0  ;;  %v194_v21 = vadd.f32 %v193_v17, %v74_v2  ;;  %v195_v22 = vpop.f32.mrb[3].mxu1  ;;  %v1699_v62 = vld [vmem:[#allocation2 + $0x2f0] ss:$12 sps:$4 sm:$0xff]  }
 0x103   :  { %v153_v11 = vadd.f32 %v152_v9, %v70_v0  ;;  %v199_v18 = vmax.f32 %v149_v6, 0.0  ;;  %v201_v24 = vmax.f32 %v192_v16, 0.0  ;;  %v196_v25 = vadd.f32 %v195_v22, %v78_v5  ;;  %v1700_v0 = vld [vmem:[#allocation2 + $0x230] ss:$12 sps:$4 sm:$0xff]   ;;  %v1701_v2 = vld [vmem:[#allocation2 + $0x240] ss:$12 sps:$4 sm:$0xff]  }
 0x104   :  { %v202_v15 = vmax.f32 %v151_v8, 0.0  ;;  %v204_v29 = vmax.f32 %v194_v21, 0.0  ;;  %v1706_v3 = vld [vmem:[#allocation2 + $0x25c] ss:$12 sps:$4 sm:$0xff]   ;;  %v1709_v5 = vld [vmem:[#allocation2 + $0x274] ss:$12 sps:$4 sm:$0xff]  }
 0x105   :  { %v203_v19 = vmax.f32 %v153_v11, 0.0  ;;  %v205_v32 = vmax.f32 %v196_v25, 0.0  ;;  %v1707_v6 = vld [vmem:[#allocation2 + $0x270] ss:$12 sps:$4 sm:$0xff]   ;;  %v1712_v7 = vld [vmem:[#allocation2 + $0x28c] ss:$12 sps:$4 sm:$0xff]  }
 0x106   :  { %v206_v23 = vpack.c.bf16 %v202_v15, %v198_v14  ;;  %v1900_v33 = vpack.c.bf16 %v204_v29, %v200_v20  ;;  %v1710_v8 = vld [vmem:[#allocation2 + $0x288] ss:$12 sps:$4 sm:$0xff]   ;;  %v1715_v9 = vld [vmem:[#allocation2 + $0x2a4] ss:$12 sps:$4 sm:$0xff]   ;;  %v1724_v15 = vld [vmem:[#allocation2 + $0x2ec] ss:$12 sps:$4 sm:$0xff]  }
 0x107   :  { %v207_v26 = vpack.c.bf16 %v203_v19, %v199_v18  ;;  %v209_v34 = vpack.c.bf16 %v205_v32, %v201_v24  ;;  %v1718_v11 = vld [vmem:[#allocation2 + $0x2bc] ss:$12 sps:$4 sm:$0xff]   ;;  %v1716_v12 = vld [vmem:[#allocation2 + $0x2b8] ss:$12 sps:$4 sm:$0xff]   ;;  %v1729_v21 = vld [vmem:[#allocation4 + $0x50] sm:$0xff]  }
 0x108   :  { %v1719_v14 = vld [vmem:[#allocation2 + $0x2d0] ss:$12 sps:$4 sm:$0xff]   ;;  %v1722_v16 = vld [vmem:[#allocation2 + $0x2e8] ss:$12 sps:$4 sm:$0xff]   ;;  %v1725_v17 = vld [vmem:[#allocation4 + $0x40] sm:$0xff]  }
 0x109   :  { %899 = vmatprep.mubr.bf16.mxu0 %v207_v26  ;;  %985 = vmatprep.mubr.bf16.mxu1 %v207_v26  ;;  %v1726_v18 = vld [vmem:[#allocation4] sm:$0xff]   ;;  %v1727_v19 = vld [vmem:[#allocation4 + $0x48] sm:$0xff]   ;;  %v1730_v22 = vld [vmem:[#allocation4 + $0x10] sm:$0xff]  }
 0x10a   :  { %900 = vmatmul.mubr.bf16.vlgmr.msra.gmra.mrb[4].mxu0 %v206_v23  ;;  %986 = vmatmul.mubr.bf16.vlgmr.msra.gmra.mrb[4].mxu1 %v206_v23  ;;  %v1728_v20 = vld [vmem:[#allocation4 + $0x8] sm:$0xff]   ;;  %v1731_v23 = vld [vmem:[#allocation4 + $0x58] sm:$0xff]   ;;  %v1733_v25 = vld [vmem:[#allocation4 + $0x60] sm:$0xff]  }
 0x10b   :  { %911 = vmatpush1.bf16.msra.mxu0 %v1661_v27  ;;  %1501 = vmatpush3.bf16.msra.mxu1 %v1665_v28  ;;  %v1732_v24 = vld [vmem:[#allocation4 + $0x18] sm:$0xff]   ;;  %v1734_v26 = vld [vmem:[#allocation4 + $0x20] sm:$0xff]   ;;  %v1735_v27 = vld [vmem:[#allocation4 + $0x68] sm:$0xff]  }
 0x10c   :  { %912 = vmatprep.subr.bf16.mxu0 %v1668_v30  ;;  %1502 = vmatprep.subr.bf16.mxu1 %v1669_v31  ;;  %v1736_v28 = vld [vmem:[#allocation4 + $0x28] sm:$0xff]   ;;  %v1737_v29 = vld [vmem:[#allocation4 + $0x70] sm:$0xff]   ;;  %v1739_v31 = vld [vmem:[#allocation4 + $0x78] sm:$0xff]  }
 0x10d   :  { %1026 = vmatprep.mubr.bf16.mxu1 %v209_v34  ;;  %942 = vmatprep.mubr.bf16.mxu0 %v209_v34  ;;  %v1738_v30 = vld [vmem:[#allocation4 + $0x30] sm:$0xff]   ;;  %v1740_v32 = vld [vmem:[#allocation4 + $0x38] sm:$0xff]  }
 0x10f   :  { %913 = vmatpush1.bf16.msra.mxu0 %v1666_v35  ;;  %1503 = vmatpush3.bf16.msra.mxu1 %v1670_v36 }
 0x110   :  { %914 = vmatprep.subr.bf16.mxu0 %v1673_v37  ;;  %1504 = vmatprep.subr.bf16.mxu1 %v1674_v38 }
 0x113   :  { %915 = vmatpush1.bf16.msra.mxu0 %v1671_v39  ;;  %1505 = vmatpush3.bf16.msra.mxu1 %v1675_v40  ;;  %v338_v40 = vld [vmem:[%s1932_s4] sm:$0x7] }
 0x114   :  { %916 = vmatprep.subr.bf16.mxu0 %v1678_v41  ;;  %1506 = vmatprep.subr.bf16.mxu1 %v1679_v42  ;;  %v351_v41 = vrot.slane %v338_v40, %v73_v61 }
 0x117   :  { %917 = vmatpush1.bf16.msra.mxu0 %v1676_v43  ;;  %1507 = vmatpush3.bf16.msra.mxu1 %v1680_v44 }
 0x118   :  { %918 = vmatprep.subr.bf16.mxu0 %v1683_v45  ;;  %1508 = vmatprep.subr.bf16.mxu1 %v1684_v46 }
 0x11b   :  { %919 = vmatpush1.bf16.msra.mxu0 %v1681_v47  ;;  %1509 = vmatpush3.bf16.msra.mxu1 %v1685_v48 }
 0x11c   :  { %920 = vmatprep.subr.bf16.mxu0 %v1688_v49  ;;  %1510 = vmatprep.subr.bf16.mxu1 %v1689_v50 }
 0x11f   :  { %921 = vmatpush1.bf16.msra.mxu0 %v1686_v51  ;;  %1511 = vmatpush3.bf16.msra.mxu1 %v1690_v52 }
 0x120   :  { %922 = vmatprep.subr.bf16.mxu0 %v1693_v53  ;;  %1512 = vmatprep.subr.bf16.mxu1 %v1694_v54 }
 0x123   :  { %923 = vmatpush1.bf16.msra.mxu0 %v1691_v55  ;;  %1513 = vmatpush3.bf16.msra.mxu1 %v1695_v56  ;;  %v343_v55 = vrot.slane %v338_v40, %v65_v58  ;;  %v347_v56 = vrot.slane %v338_v40, %v69_v60  ;;  %v1743_v58 = vld [vmem:[#allocation4 + $0x90] sm:$0xff]   ;;  %v1744_v60 = vld [vmem:[#allocation4 + $0x98] sm:$0xff]  }
 0x124   :  { %924 = vmatprep.subr.bf16.mxu0 %v1698_v59  ;;  %1514 = vmatprep.subr.bf16.mxu1 %v1699_v62 }
 0x127   :  { %925 = vmatpush1.bf16.msra.mxu0 %v1696_v63  ;;  %1515 = vmatpush3.bf16.msra.mxu1 %v1700_v0 }
 0x128   :  { %926 = vmatprep.subr.bf16.mxu0 %v1703_v1  ;;  %1522 = vmatprep.subr.bf16.mxu1 %v1725_v17 }
 0x12a   :  { %1027 = vmatmul.mubr.bf16.vlgmr.msra.gmra.mrb[8].mxu1 %v1900_v33 }
 0x12b   :  { %927 = vmatpush1.bf16.msra.mxu0 %v1701_v2  ;;  %1523 = vmatpush3.bf16.msra.mxu1 %v1726_v18 }
 0x12c   :  { %928 = vmatprep.subr.bf16.mxu0 %v1706_v3  ;;  %1524 = vmatprep.subr.bf16.mxu1 %v1727_v19 }
 0x12f   :  { %929 = vmatpush1.bf16.msra.mxu0 %v1704_v4  ;;  %1525 = vmatpush3.bf16.msra.mxu1 %v1728_v20 }
 0x130   :  { %930 = vmatprep.subr.bf16.mxu0 %v1709_v5  ;;  %1526 = vmatprep.subr.bf16.mxu1 %v1729_v21  ;;  %v1444_v21 = vld [vmem:[%s1934_s6] ss:$0 sm:$0xff] }
 0x133   :  { %931 = vmatpush1.bf16.msra.mxu0 %v1707_v6  ;;  %1527 = vmatpush3.bf16.msra.mxu1 %v1730_v22 }
 0x134   :  { %932 = vmatprep.subr.bf16.mxu0 %v1712_v7  ;;  %1528 = vmatprep.subr.bf16.mxu1 %v1731_v23 }
 0x137   :  { %933 = vmatpush1.bf16.msra.mxu0 %v1710_v8  ;;  %1529 = vmatpush3.bf16.msra.mxu1 %v1732_v24 }
 0x138   :  { %934 = vmatprep.subr.bf16.mxu0 %v1715_v9  ;;  %1530 = vmatprep.subr.bf16.mxu1 %v1733_v25 }
 0x13b   :  { %935 = vmatpush1.bf16.msra.mxu0 %v1713_v10  ;;  %1531 = vmatpush3.bf16.msra.mxu1 %v1734_v26  ;;  %v1741_v10 = vld [vmem:[#allocation4 + $0x80] sm:$0xff]  }
 0x13c   :  { %936 = vmatprep.subr.bf16.mxu0 %v1718_v11  ;;  %1532 = vmatprep.subr.bf16.mxu1 %v1735_v27  ;;  %v1745_v11 = vld [vmem:[#allocation4 + $0xa0] sm:$0xff]  }
 0x13f   :  { %937 = vmatpush1.bf16.msra.mxu0 %v1716_v12  ;;  %1533 = vmatpush3.bf16.msra.mxu1 %v1736_v28  ;;  %v1746_v12 = vld [vmem:[#allocation4 + $0xa8] sm:$0xff]  }
 0x140   :  { %938 = vmatprep.subr.bf16.mxu0 %v1721_v13  ;;  %1534 = vmatprep.subr.bf16.mxu1 %v1737_v29  ;;  %v1747_v13 = vld [vmem:[#allocation4 + $0xb0] sm:$0xff]  }
 0x143   :  { %939 = vmatpush1.bf16.msra.mxu0 %v1719_v14  ;;  %1535 = vmatpush3.bf16.msra.mxu1 %v1738_v30  ;;  %v1748_v14 = vld [vmem:[#allocation4 + $0xb8] sm:$0xff]  }
 0x144   :  { %940 = vmatprep.subr.bf16.mxu0 %v1724_v15  ;;  %1536 = vmatprep.subr.bf16.mxu1 %v1739_v31 }
 0x147   :  { %941 = vmatpush1.bf16.msra.mxu0 %v1722_v16  ;;  %1537 = vmatpush3.bf16.msra.mxu1 %v1740_v32 }
 0x14a   :  { %943 = vmatmul.mubr.bf16.vlgmr.msra.gmra.mrb[4].mxu0 %v1900_v33  ;;  %v1804_v33 = vmov 0.0  }
 0x14b   :  { %1553 = vmatprep.subr.bf16.mxu1 %v1804_v33 }
 0x1dd   :  { %v1494_v34 = vpop.f32.mrb[4].mxu1 }
 0x1de   :  { %v1495_v35 = vpop.f32.mrb[5].mxu1 }
 0x1df   :  { %v1496_v36 = vadd.f32 %v1495_v35, %v1494_v34  ;;  %v1497_v37 = vpop.f32.mrb[6].mxu1 }
 0x1e0   :  { %v1498_v38 = vpop.f32.mrb[7].mxu1 }
 0x1e1   :  { %v1499_v39 = vadd.f32 %v1498_v38, %v1497_v37  ;;  %v988_v44 = vadd.f32 %v1496_v36, %v351_v41 }
 0x1e3   :  { %v991_v48 = vadd.f32 %v1499_v39, %v351_v41 }
 0x1fd   :  { %v1516_v42 = vpop.f32.mrb[8].mxu1 }
 0x1fe   :  { %v1517_v43 = vpop.f32.mrb[9].mxu1 }
 0x1ff   :  { %v1518_v45 = vadd.f32 %v1517_v43, %v1516_v42  ;;  %v1519_v46 = vpop.f32.mrb[10].mxu1 }
 0x200   :  { %v1520_v47 = vpop.f32.mrb[11].mxu1 }
 0x201   :  { %v1029_v49 = vadd.f32 %v1518_v45, %v988_v44  ;;  %v1521_v50 = vadd.f32 %v1520_v47, %v1519_v46 }
 0x203   :  { %v1032_v51 = vadd.f32 %v1521_v50, %v991_v48  ;;  %v1037_v52 = vmax.f32 %v1029_v49, 0.0 }
 0x205   :  { %v1040_v53 = vmax.f32 %v1032_v51, 0.0 }
 0x207   :  { %v1043_v54 = vpack.c.bf16 %v1040_v53, %v1037_v52 }
 0x21d   :  { %v944_v61 = vpop.f32.mrb[4].mxu0 }
 0x21e   :  { %v1573_v59 = vadd.f32 %v944_v61, %v343_v55  ;;  %v946_v62 = vpop.f32.mrb[5].mxu0 }
 0x21f   :  { %v1574_v63 = vadd.f32 %v946_v62, %v347_v56  ;;  %v948_v0 = vpop.f32.mrb[6].mxu0 }
 0x220   :  { %v1575_v1 = vadd.f32 %v948_v0, %v343_v55  ;;  %v950_v2 = vpop.f32.mrb[7].mxu0  ;;  %v1035_v4 = vmax.f32 %v1573_v59, 0.0 }
 0x221   :  { %v1576_v3 = vadd.f32 %v950_v2, %v347_v56  ;;  %v1036_v6 = vmax.f32 %v1574_v63, 0.0 }
 0x222   :  { %v1038_v5 = vmax.f32 %v1575_v1, 0.0 }
 0x223   :  { %v1039_v7 = vmax.f32 %v1576_v3, 0.0 }
 0x224   :  { %v1041_v8 = vpack.c.bf16 %v1038_v5, %v1035_v4 }
 0x225   :  { %v1042_v9 = vpack.c.bf16 %v1039_v7, %v1036_v6 }
 0x227   :  { %1275 = vmatprep.mubr.bf16.mxu1 %v1042_v9 }
 0x228   :  { %1276 = vmatmul.mubr.bf16.vlgmr.msra.gmra.mrb[12].mxu1 %v1041_v8 }
 0x229   :  { %1554 = vmatpush3.bf16.msra.mxu1 %v1741_v10  ;;  %1569 = vmatprep.mubr.msk.bf16.mxu1 %vm1805_vm1, %v1804_v33 }
 0x22a   :  { %1555 = vmatprep.subr.bf16.mxu1 %v1804_v33 }
 0x22d   :  { %1556 = vmatpush3.bf16.msra.mxu1 %v1742_v57 }
 0x22e   :  { %1557 = vmatprep.subr.bf16.mxu1 %v1804_v33 }
 0x231   :  { %1558 = vmatpush3.bf16.msra.mxu1 %v1743_v58 }
 0x232   :  { %1559 = vmatprep.subr.bf16.mxu1 %v1804_v33 }
 0x235   :  { %1560 = vmatpush3.bf16.msra.mxu1 %v1744_v60 }
 0x236   :  { %1561 = vmatprep.subr.bf16.mxu1 %v1804_v33 }
 0x239   :  { %1562 = vmatpush3.bf16.msra.mxu1 %v1745_v11 }
 0x23a   :  { %1563 = vmatprep.subr.bf16.mxu1 %v1804_v33 }
 0x23d   :  { %1564 = vmatpush3.bf16.msra.mxu1 %v1746_v12 }
 0x23e   :  { %1565 = vmatprep.subr.bf16.mxu1 %v1804_v33 }
 0x241   :  { %1566 = vmatpush3.bf16.msra.mxu1 %v1747_v13 }
 0x242   :  { %1567 = vmatprep.subr.bf16.mxu1 %v1804_v33 }
 0x245   :  { %1568 = vmatpush3.bf16.msra.mxu1 %v1748_v14 }
 0x248   :  { %1570 = vmatmul.mubr.bf16.vlgmr.msra.gmra.mrb[16].mxu1 %v1043_v54 }
 0x2fb   :  { %v1538_v15 = vpop.f32.mrb[12].mxu1 }
 0x2fc   :  { %v1539_v16 = vpop.f32.mrb[13].mxu1 }
 0x2fd   :  { %v1540_v17 = vadd.f32 %v1539_v16, %v1538_v15  ;;  %v1541_v18 = vpop.f32.mrb[14].mxu1 }
 0x2fe   :  { %v1542_v19 = vpop.f32.mrb[15].mxu1 }
 0x2ff   :  { %v1543_v20 = vadd.f32 %v1542_v19, %v1541_v18  ;;  %v1278_v22 = vadd.f32 %v1540_v17, %v1444_v21 }
 0x301   :  { %v1281_v26 = vadd.f32 %v1543_v20, %v1444_v21 }
 0x31b   :  { %v1318_v23 = vpop.f32.mrb[16].mxu1 }
 0x31c   :  { %v1319_v24 = vadd.f32 %v1318_v23, %v1278_v22  ;;  %v1571_v25 = vpop.f32.mrb[17].mxu1 }
 0x31d   :  { %v1321_v27 = vpop.f32.mrb[18].mxu1 }
 0x31e   :  { %v1322_v28 = vadd.f32 %v1321_v27, %v1281_v26  ;;  %v1572_v29 = vpop.f32.mrb[19].mxu1 }
 0x320   :  { %v1476_v30 = vpack.c.bf16 %v1322_v28, %v1319_v24 }
 0x322   :  { %1477 = vst [vmem:[%s1935_s7] sm:$0xff] %v1476_v30  }
 0x323   :  { %1339 = vsyncpa [#allocation3], 1 }
 0x324   :  { %1340 = vsyncpa [#allocation5], 1 }

</bundles_post_ra>
